<compile_context>
chip_gen: v7x
topology: tpu7x:2x2x1
jax: 0.10.0
libtpu: 0.0.40
codegen_flags: <defaults>
</compile_context>

<pallas_src>
import jax
import jax.numpy as jnp
from jax.experimental import pallas as pl
from jax.experimental.pallas import tpu as pltpu

_MiB = 1024 * 1024
# Per-buffer budget for the resident (tm, K) activation panel; the pipeline
# double-buffers it, so the worst case is 2x this.
_X_PANEL_BYTES = 8 * _MiB


def _round_up(x, m):
    return ((x + m - 1) // m) * m


def _linear_kernel_single_k(x_ref, w_ref, o_ref):
    """Single K step: write the MXU result directly, no accumulator scratch."""
    o_ref[...] = jax.lax.dot_general(
        x_ref[...], w_ref[...],
        dimension_numbers=(((1,), (1,)), ((), ())),   # contract last axes: x @ w.T
        preferred_element_type=jnp.float32,
    ).astype(o_ref.dtype)


def _linear_kernel_multi_k(x_ref, w_ref, o_ref, acc_ref):
    """Multi K step: x_ref is the full (nk, tm, tk) activation panel (resident
    across the whole N/K sweep); weight tiles stream; f32 accumulator."""
    k = pl.program_id(2)

    @pl.when(k == 0)
    def _init():
        acc_ref[...] = jnp.zeros_like(acc_ref)

    x_k = x_ref[k]                                    # (tm, tk), natively tiled
    acc_ref[...] += jax.lax.dot_general(
        x_k, w_ref[...],
        dimension_numbers=(((1,), (1,)), ((), ())),   # weight stays (out, in)
        preferred_element_type=jnp.float32,
    )

    @pl.when(k == pl.num_programs(2) - 1)
    def _store():
        o_ref[...] = acc_ref[...].astype(o_ref.dtype)


def classifier_forward(x, weight, *, compute_dtype=None,
                       tm_max=256, tn_max=1024, tk_max=1024):
    """Forward pass of Classifier: logits = x @ weight.T  (bias=False).

    Args:
      x: (B, in_panel) or (in_panel,) float array.
      weight: (out_panel, in_panel) float array (PyTorch nn.Linear layout).
      compute_dtype: optional dtype to feed the MXU with (e.g. jnp.bfloat16
        for the bandwidth-bound regime); accumulation is always f32 and the
        output keeps the input dtype.  None = keep input dtype (exact).

    Returns:
      (B, out_panel) logits; a 1D input is promoted to batch=1, matching the
      `unsqueeze(0)` in the reference module.
    """
    if x.ndim == 1:
        x = x[None, :]                                # dim()==1 -> unsqueeze(0)

    B, in_panel = x.shape
    out_panel, in_panel_w = weight.shape
    assert in_panel == in_panel_w, "weight / input feature-dim mismatch"

    out_dtype = x.dtype
    if compute_dtype is not None:
        x = x.astype(compute_dtype)
        weight = weight.astype(compute_dtype)
    c_itemsize = jnp.dtype(x.dtype).itemsize
    o_itemsize = jnp.dtype(out_dtype).itemsize

    # Normalise tile caps to legal alignments.
    tm_max = max(8, (tm_max // 8) * 8)
    tn_max = max(128, (tn_max // 128) * 128)
    tk_max = max(128, (tk_max // 128) * 128)

    # ---- K tiling: never pad/copy the weight in the common case ----
    if in_panel <= tk_max:
        tk, Kp = in_panel, in_panel                   # single K step, full extent
    else:
        tk = None
        t = tk_max
        while t >= 128:                               # largest 128-multiple divisor
            if in_panel % t == 0:
                tk = t
                break
            t -= 128
        if tk is None:
            # Rare fallback: in_panel > tk_max and not a multiple of 128.
            # Pad K once (hidden dims are essentially always 128-multiples,
            # so the common path never touches this).
            tk = tk_max
            Kp = _round_up(in_panel, tk)
        else:
            Kp = in_panel
    nk = Kp // tk

    if Kp != in_panel:
        x = jnp.pad(x, ((0, 0), (0, Kp - in_panel)))
        weight = jnp.pad(weight, ((0, 0), (0, Kp - in_panel)))

    # ---- M tiling (multiple of 8, or the full batch) ----
    tm = min(tm_max, B)
    rows_budget = max(8, (_X_PANEL_BYTES // max(1, Kp * c_itemsize)) // 8 * 8)
    if tm > rows_budget:                              # keep resident x panel small
        tm = rows_budget
    m_blocks = pl.cdiv(B, tm)

    # ---- N tiling ----
    tn = out_panel if out_panel <= tn_max else tn_max
    # v7x has 2 TensorCores sharded over "parallel" grid axes: if the M grid
    # collapsed to one block, split N so both cores get work.
    if m_blocks == 1 and pl.cdiv(out_panel, tn) == 1 and out_panel >= 256:
        tn = _round_up(pl.cdiv(out_panel, 2), 128)
    n_blocks = pl.cdiv(out_panel, tn)

    # Explicit scoped-VMEM limit derived from the real tile footprint
    # (v5e scoped default is 16 MiB; stay well under v7x's 64 MiB physical).
    est = (2 * tm * Kp * c_itemsize                   # resident activation panel
           + 2 * tn * tk * c_itemsize                 # streamed weight tile
           + 2 * tm * tn * o_itemsize                 # output tile
           + (tm * tn * 4 if nk > 1 else 0))          # f32 accumulator scratch
    vmem_limit = int(min(max(est * 3 // 2, 32 * _MiB), 60 * _MiB))

    if nk == 1:
        # Typical classifier head (in_panel <= tk_max): one K step, no scratch.
        out = pl.pallas_call(
            _linear_kernel_single_k,
            out_shape=jax.ShapeDtypeStruct((B, out_panel), out_dtype),
            grid=(m_blocks, n_blocks),
            in_specs=[
                pl.BlockSpec((tm, Kp), lambda i, j: (i, 0)),   # resident per M block
                pl.BlockSpec((tn, Kp), lambda i, j: (j, 0)),   # (out, in) layout
            ],
            out_specs=pl.BlockSpec((tm, tn), lambda i, j: (i, j)),
            compiler_params=pltpu.CompilerParams(
                dimension_semantics=("parallel", "parallel"),
                vmem_limit_bytes=vmem_limit,
            ),
        )(x, weight)
    else:
        # Pre-chunk the activations to (nk, B, tk): a tiny one-time copy of the
        # activations (never the weight) so each K chunk is a natively tiled
        # (tm, tk) slab and the whole panel stays VMEM-resident across (j, k).
        x3 = jnp.transpose(x.reshape(B, nk, tk), (1, 0, 2))
        out = pl.pallas_call(
            _linear_kernel_multi_k,
            out_shape=jax.ShapeDtypeStruct((B, out_panel), out_dtype),
            grid=(m_blocks, n_blocks, nk),
            in_specs=[
                pl.BlockSpec((nk, tm, tk), lambda i, j, k: (0, i, 0)),
                pl.BlockSpec((tn, tk), lambda i, j, k: (j, k)),
            ],
            out_specs=pl.BlockSpec((tm, tn), lambda i, j, k: (i, j)),
            scratch_shapes=[pltpu.VMEM((tm, tn), jnp.float32)],
            compiler_params=pltpu.CompilerParams(
                dimension_semantics=("parallel", "parallel", "arbitrary"),
                vmem_limit_bytes=vmem_limit,
            ),
        )(x3, weight)

    return out


if __name__ == "__main__":
    key = jax.random.PRNGKey(0)
    kx, kw, kx2, kw2, kx3, kw3 = jax.random.split(key, 6)

    # --- Small, module-consistent shapes (batch=2, in_panel=32, out_panel=8) ---
    batch, in_panel, out_panel = 2, 32, 8
    x = jax.random.normal(kx, (batch, in_panel), dtype=jnp.float32)
    bound = 1.0 / jnp.sqrt(in_panel)                  # nn.Linear init range
    weight = jax.random.uniform(
        kw, (out_panel, in_panel), dtype=jnp.float32, minval=-bound, maxval=bound
    )

    logits = classifier_forward(x, weight)
    jax.block_until_ready(logits)
    ref = x @ weight.T
    assert logits.shape == (batch, out_panel)
    assert jnp.allclose(logits, ref, atol=1e-4, rtol=1e-4)

    # 1D-input path (unsqueeze(0) semantics).
    logits_1d = classifier_forward(x[0], weight)
    jax.block_until_ready(logits_1d)
    assert logits_1d.shape == (1, out_panel)
    assert jnp.allclose(logits_1d[0], ref[0], atol=1e-4, rtol=1e-4)

    # --- Multi-K accumulator path + unaligned N tail (no padding, no slicing) ---
    B2, K2, N2 = 16, 256, 200
    x2 = jax.random.normal(kx2, (B2, K2), dtype=jnp.float32)
    w2 = jax.random.uniform(
        kw2, (N2, K2), dtype=jnp.float32,
        minval=-1.0 / jnp.sqrt(K2), maxval=1.0 / jnp.sqrt(K2),
    )
    out2 = classifier_forward(x2, w2, tm_max=8, tn_max=128, tk_max=128)
    jax.block_until_ready(out2)
    ref2 = x2 @ w2.T
    assert out2.shape == (B2, N2)
    assert jnp.allclose(out2, ref2, atol=1e-4, rtol=1e-4)

    # bf16-feed option (f32 accumulate), looser tolerance.
    out2_bf = classifier_forward(x2, w2, compute_dtype=jnp.bfloat16,
                                 tm_max=8, tn_max=128, tk_max=128)
    jax.block_until_ready(out2_bf)
    assert out2_bf.dtype == jnp.float32
    assert jnp.allclose(out2_bf, ref2, atol=5e-2, rtol=5e-2)

    # --- v7x two-TensorCore heuristic: M grid = 1 -> N gets split into 2 blocks ---
    B3, K3, N3 = 4, 128, 384
    x3 = jax.random.normal(kx3, (B3, K3), dtype=jnp.float32)
    w3 = jax.random.uniform(
        kw3, (N3, K3), dtype=jnp.float32,
        minval=-1.0 / jnp.sqrt(K3), maxval=1.0 / jnp.sqrt(K3),
    )
    out3 = classifier_forward(x3, w3)
    jax.block_until_ready(out3)
    ref3 = x3 @ w3.T
    assert out3.shape == (B3, N3)
    assert jnp.allclose(out3, ref3, atol=1e-4, rtol=1e-4)

    print("KERNEL_OK")
</pallas_src>

<mosaic_0001>
module attributes {stable_mosaic.version = 11 : i64} {
  func.func @_linear_kernel_single_k(%arg0: i32, %arg1: i32, %arg2: memref<2x32xf32, #tpu.memory_space<vmem>>, %arg3: memref<8x32xf32, #tpu.memory_space<vmem>>, %arg4: memref<2x8xf32, #tpu.memory_space<vmem>>) attributes {dimension_semantics = [#tpu.dimension_semantics<parallel>, #tpu.dimension_semantics<parallel>], iteration_bounds = array<i64: 1, 1>, scalar_prefetch = 0 : i64, scratch_operands = 0 : i64, tpu.core_type = #tpu.core_type<tc>, window_params = [{transform_indices = @transform_0, window_bounds = array<i64: 2, 32>}, {transform_indices = @transform_1, window_bounds = array<i64: 8, 32>}, {transform_indices = @transform_2, window_bounds = array<i64: 2, 8>}]} {
    %c0 = arith.constant 0 : index
    %c0_0 = arith.constant 0 : index
    %0 = vector.load %arg2[%c0, %c0_0] : memref<2x32xf32, #tpu.memory_space<vmem>>, vector<2x32xf32>
    %c0_1 = arith.constant 0 : index
    %c0_2 = arith.constant 0 : index
    %1 = vector.load %arg3[%c0_1, %c0_2] : memref<8x32xf32, #tpu.memory_space<vmem>>, vector<8x32xf32>
    %cst = arith.constant dense<0.000000e+00> : vector<2x8xf32>
    %2 = tpu.matmul %0, %1, %cst {dimension_numbers = #tpu.dot_dimension_numbers<[1], [1], [0], [0], [0, 0, 1, 0], [], []>} : vector<2x32xf32>, vector<8x32xf32>, vector<2x8xf32> -> vector<2x8xf32>
    %c0_3 = arith.constant 0 : index
    %c0_4 = arith.constant 0 : index
    %3 = vector.load %arg4[%c0_3, %c0_4] : memref<2x8xf32, #tpu.memory_space<vmem>>, vector<2x8xf32>
    tpu.vector_store %arg4[%c0_3, %c0_4], %2 {strides = array<i32>} : memref<2x8xf32, #tpu.memory_space<vmem>>, vector<2x8xf32>,
    return
  }
  func.func @transform_0(%arg0: i32, %arg1: i32) -> (i32, i32) {
    %c0_i32 = arith.constant 0 : i32
    %c0_i32_0 = arith.constant 0 : i32
    return %arg0, %c0_i32 : i32, i32
  }
  func.func @transform_1(%arg0: i32, %arg1: i32) -> (i32, i32) {
    %c0_i32 = arith.constant 0 : i32
    %c0_i32_0 = arith.constant 0 : i32
    return %arg1, %c0_i32 : i32, i32
  }
  func.func @transform_2(%arg0: i32, %arg1: i32) -> (i32, i32) {
    %c0_i32 = arith.constant 0 : i32
    return %arg0, %arg1 : i32, i32
  }
}

</mosaic_0001>

<bundles_post_ra>
// kernel: tpu_custom_call.1
= control target key start
LH: loop header
LB: loop body
LE: loop exit
PB: predicated region body
PF: predicated region fallthrough
CT: control target
= control target key end

     0   :  { %7 = vsyncpa [#allocation3], 0  ;;  %s275_s0 = inlined_call_operand.hbm [shape: f32[2,32], index: 0, kind: input, shape index: {}]   ;;  %s276_s1 = inlined_call_operand.hbm [shape: f32[8,32], index: 1, kind: input, shape index: {}]   ;;  %s277_s2 = inlined_call_operand.hbm [shape: f32[2,8], index: 2, kind: output, shape index: {}]  }
   0x1   :  { %8 = vsyncpa [#allocation6], 0 }
   0x2   :  { %9 = vsyncpa [#allocation4], 0  ;;  %s219_s9 = smov [#allocation2]   ;;  %s220_s11 = smov [#allocation5]  }
   0x3   :  { %s16_s10 = sshll.u32 %s219_s9, 4  ;;  %s26_s12 = sshll.u32 %s220_s11, 4  ;;  %s17_s10 = int_to_ptr.vmem [resolvable:$true] %s16_s10  ;;  %s27_s12 = int_to_ptr.vmem [resolvable:$true] %s26_s12 }
   0x4   :  { %s147_s15 = scalar_lea.hbm %s275_s0, 32 }
   0x5   :  { %p148_p0 = scmp.ne.s32.totalorder %s275_s0, %s147_s15  ;;  %p151_p1 = scmp.lt.u32.totalorder %s147_s15, %s275_s0 }
   0x7   :  { %p153_p2 = pnand %p151_p1, %p148_p0 }
   0x9   :  { %156 = shalt.err (!%p153_p2)
}
   0xa   :  { %s157_s20 = scalar_lea.vmem %s17_s10, 32  ;;  %p162_p4 = scmp.lt.s32.totalorder %s17_s10, %s17_s10 }
   0xb   :  { %p158_p3 = scmp.ne.s32.totalorder %s17_s10, %s157_s20  ;;  %p163_p5 = scmp.lt.s32.totalorder %s157_s20, %s157_s20 }
   0xd   :  { %p164_p6 = por %p163_p5, %p162_p4 }
   0xf   :  { %p165_p7 = pnand %p164_p6, %p158_p3 }
  0x11   :  { %168 = shalt.err (!%p165_p7)
}
  0x12   :  { %19 = dma.hbm_to_vmem [thread:$0]  %s275_s0, 32, %s17_s10, [#allocation3]  }
  0x13   :  { %s169_s25 = scalar_lea.hbm %s276_s1, 128 }
  0x14   :  { %p170_p8 = scmp.ne.s32.totalorder %s276_s1, %s169_s25  ;;  %p173_p9 = scmp.lt.u32.totalorder %s169_s25, %s276_s1 }
  0x16   :  { %p175_p10 = pnand %p173_p9, %p170_p8 }
  0x18   :  { %178 = shalt.err (!%p175_p10)
}
  0x19   :  { %s179_s30 = scalar_lea.vmem %s27_s12, 128  ;;  %p184_p12 = scmp.lt.s32.totalorder %s27_s12, %s27_s12 }
  0x1a   :  { %p180_p11 = scmp.ne.s32.totalorder %s27_s12, %s179_s30  ;;  %p185_p13 = scmp.lt.s32.totalorder %s179_s30, %s179_s30 }
  0x1c   :  { %p186_p0 = por %p185_p13, %p184_p12 }
  0x1e   :  { %p187_p1 = pnand %p186_p0, %p180_p11 }
  0x20   :  { %190 = shalt.err (!%p187_p1)
}
  0x21   :  { %29 = dma.hbm_to_vmem [thread:$0]  %s276_s1, 128, %s27_s12, [#allocation6]  }
  0x22   :  { %213 = dma.done.wait [#allocation3], 32  }
  0x23   :  { %214 = vsyncadd [#allocation3], 4294967264 }
  0x24   :  { %215 = dma.done.wait [#allocation6], 128  }
  0x25   :  { %216 = vsyncadd [#allocation6], 4294967168  ;;  %v221_v0 = vmov 0.0   ;;  %vm222_vm0 = vmmov 0   ;;  %vm38_vm1 = vcmask 261120   ;;  %v37_v1 = vld [vmem:[#allocation5] sm:$0xff] }
  0x26   :  { %137 = vmatprep.subr.mxu0 %v221_v0  ;;  %139 = vmatprep.mubr.msk.f32.mxu0 %vm222_vm0, %v221_v0  ;;  %v36_v2 = vld [vmem:[#allocation2] sm:$0x3]  ;;  %s223_s4 = smov [#allocation7]   ;;  %vm115_vm2 = vcmask 58368  }
  0x27   :  { %138 = vmatpush3.xpose.msk.msra.mxu0 %vm38_vm1, %v37_v1  ;;  %s123_s5 = sshll.u32 %s223_s4, 4  ;;  %s124_s5 = int_to_ptr.vmem [resolvable:$true] %s123_s5 }
  0x28   :  { %s191_s1 = scalar_lea.vmem %s124_s5, 32  ;;  %p196_p3 = scmp.lt.s32.totalorder %s124_s5, %s124_s5 }
  0x29   :  { %p192_p2 = scmp.ne.s32.totalorder %s124_s5, %s191_s1  ;;  %p197_p4 = scmp.lt.s32.totalorder %s191_s1, %s191_s1 }
  0x2a   :  { %140 = vmatmul.mubr.msk.f32.vlgmr.msra.gmra.mrb[0].mxu0 %vm38_vm1, %v36_v2 }
  0x2b   :  { %p198_p5 = por %p197_p4, %p196_p3 }
  0x2d   :  { %p199_p6 = pnand %p198_p5, %p192_p2 }
  0xfd   :  { %v111_v3 = vpop.f32.mrb[0].mxu0 }
  0xfe   :  { %v141_v4 = vpop.f32.mrb[1].mxu0  ;;  %116 = vst.msk [vmem:[#allocation7] sm:$0x3] %vm115_vm2, %v111_v3 }
  0xff   :  { %202 = shalt.err (!%p199_p6)
}
 0x100   :  { %s203_s8 = scalar_lea.hbm %s277_s2, 32 }
 0x101   :  { %p204_p7 = scmp.ne.s32.totalorder %s277_s2, %s203_s8  ;;  %p207_p8 = scmp.lt.u32.totalorder %s203_s8, %s277_s2 }
 0x103   :  { %p209_p9 = pnand %p207_p8, %p204_p7 }
 0x105   :  { %212 = shalt.err (!%p209_p9)
}
 0x106   :  { %126 = dma.vmem_to_hbm [thread:$0]  %s124_s5, 32, %s277_s2, [#allocation4]  }
 0x107   :  { %217 = dma.done.wait [#allocation4], 32  }
 0x108   :  { %218 = vsyncadd [#allocation4], 4294967264 }
 0x109   :  { %130 = vsyncpa [#allocation3], 1 }
 0x10a   :  { %131 = vsyncpa [#allocation6], 1 }
 0x10b   :  { %132 = vsyncpa [#allocation4], 1 }

</bundles_post_ra>
